<compile_context>
chip_gen: v6e
topology: v6e:2x2x1
jax: 0.10.0
libtpu: 0.0.40
codegen_flags: <defaults>
</compile_context>

<pallas_src>
import functools

import jax
import jax.numpy as jnp
from jax.experimental import pallas as pl
from jax.experimental.pallas import tpu as pltpu

HIDDEN = 768
FC1 = 256
OUT = 1


def _round_up(x, m):
    return ((x + m - 1) // m) * m


def _cdiv(a, b):
    return -(-a // b)


def reward_kernel(x_ref, w1_ref, b1_ref, w2_ref, b2_ref, o_ref):
    # x_ref:  (tm, 768) in-dtype  w1_ref: (768, 256) bf16   b1_ref: (1, 256) f32
    # w2_ref: (1, 256) f32        b2_ref: (1,) f32 in SMEM  o_ref:  (tm, 1)
    x = x_ref[...].astype(jnp.bfloat16)                                # MXU dtype
    h = jnp.dot(x, w1_ref[...], preferred_element_type=jnp.float32)   # (tm, 256)
    h = jnp.maximum(h + b1_ref[...], 0.0)                              # bias+ReLU
    # Second Linear (256 -> 1): VPU multiply + lane reduction (XLU) instead of
    # an N=1 MXU matmul.
    r = jnp.sum(h * w2_ref[...], axis=-1, keepdims=True) + b2_ref[0]
    o_ref[...] = r.astype(o_ref.dtype)


@functools.partial(jax.jit, static_argnames=("tm",))
def reward_model_forward(hidden_states, w1, b1, w2, b2, *, tm=2048):
    """hidden_states: (B, S, 768) -> reward: (B, S, 1) (same float dtype)."""
    B, S, H = hidden_states.shape
    assert H == HIDDEN
    M = B * S
    x2d = hidden_states.reshape(M, H)

    # Row tile: capped at `tm`, never larger than ~half the problem (so there
    # are >= 2 grid steps and the "parallel" axis can shard across v7x's two
    # TensorCores), always a multiple of 8 (sublane).  The big activation
    # tensor is NOT padded: the ragged last block is handled by Pallas
    # boundary masking.  This is safe because the matmul has no cross-row
    # reduction and the overrun output rows are never written.
    tm_eff = max(8, min(tm, _round_up(_cdiv(M, 2), 8)))
    grid_m = _cdiv(M, tm_eff)

    w1_bf = w1.astype(jnp.bfloat16)                  # resident bf16 MXU weights
    b1_2d = b1.reshape(1, FC1).astype(jnp.float32)
    w2_row = w2.reshape(1, FC1).astype(jnp.float32)  # (256, 1) -> (1, 256) row
    b2_s = b2.reshape(1).astype(jnp.float32)         # SMEM scalar

    out2d = pl.pallas_call(
        reward_kernel,
        out_shape=jax.ShapeDtypeStruct((M, OUT), hidden_states.dtype),
        grid_spec=pltpu.PrefetchScalarGridSpec(
            num_scalar_prefetch=0,
            grid=(grid_m,),
            in_specs=[
                pl.BlockSpec((tm_eff, HIDDEN), lambda i: (i, 0)),    # x row tile
                pl.BlockSpec((HIDDEN, FC1), lambda i: (0, 0)),       # W1 resident
                pl.BlockSpec((1, FC1), lambda i: (0, 0)),            # b1
                pl.BlockSpec((1, FC1), lambda i: (0, 0)),            # W2 row
                pl.BlockSpec(memory_space=pltpu.MemorySpace.SMEM),   # b2 scalar
            ],
            out_specs=pl.BlockSpec((tm_eff, OUT), lambda i: (i, 0)),
        ),
        compiler_params=pltpu.CompilerParams(
            dimension_semantics=("parallel",),   # row tiles shard across TCs
            vmem_limit_bytes=32 << 20,           # tm=2048 budget, incl. v5e
        ),
    )(x2d, w1_bf, b1_2d, w2_row, b2_s)

    return out2d.reshape(B, S, OUT)


def init_params(key):
    """Deterministic synthetic init matching nn.Linear shapes (stored transposed)."""
    k1, k2, k3, k4 = jax.random.split(key, 4)
    # PyTorch Linear stores weight as (out, in); we store (in, out) for x @ W.
    w1 = jax.random.uniform(k1, (HIDDEN, FC1), jnp.float32,
                            minval=-1.0, maxval=1.0) / jnp.sqrt(HIDDEN)
    b1 = jax.random.uniform(k2, (FC1,), jnp.float32,
                            minval=-1.0, maxval=1.0) / jnp.sqrt(HIDDEN)
    w2 = jax.random.uniform(k3, (FC1, OUT), jnp.float32,
                            minval=-1.0, maxval=1.0) / jnp.sqrt(FC1)
    b2 = jax.random.uniform(k4, (OUT,), jnp.float32,
                            minval=-1.0, maxval=1.0) / jnp.sqrt(FC1)
    return w1, b1, w2, b2


if __name__ == "__main__":
    key = jax.random.PRNGKey(0)
    kx, kp = jax.random.split(key)

    batch, seq = 2, 8
    hidden_states = jax.random.normal(kx, (batch, seq, HIDDEN), jnp.float32)
    w1, b1, w2, b2 = init_params(kp)

    reward = reward_model_forward(hidden_states, w1, b1, w2, b2)
    reward = jax.block_until_ready(reward)
    assert reward.shape == (batch, seq, 1)

    # Tight check against a reference matched to the kernel numerics
    # (bf16 MXU inputs, f32 accumulation).
    x2d = hidden_states.reshape(-1, HIDDEN)
    h_ref = jnp.maximum(
        jnp.dot(x2d.astype(jnp.bfloat16), w1.astype(jnp.bfloat16),
                preferred_element_type=jnp.float32) + b1, 0.0)
    ref_bf16 = (h_ref @ w2 + b2).reshape(batch, seq, OUT)
    assert jnp.allclose(reward, ref_bf16, atol=2e-3, rtol=2e-3), \
        float(jnp.max(jnp.abs(reward - ref_bf16)))

    # Looser check against the pure-f32 semantics of the PyTorch module.
    ref_f32 = (jnp.maximum(x2d @ w1 + b1, 0.0) @ w2 + b2).reshape(batch, seq, OUT)
    assert jnp.allclose(reward, ref_f32, atol=5e-2, rtol=5e-2)

    print("KERNEL_OK")
</pallas_src>

<mosaic_0001>
module attributes {stable_mosaic.version = 11 : i64} {
  func.func @reward_kernel(%arg0: i32, %arg1: memref<8x768xf32, #tpu.memory_space<vmem>>, %arg2: memref<768x256xbf16, #tpu.memory_space<vmem>>, %arg3: memref<1x256xf32, #tpu.memory_space<vmem>>, %arg4: memref<1x256xf32, #tpu.memory_space<vmem>>, %arg5: memref<1xf32, #tpu.memory_space<smem>>, %arg6: memref<8x1xf32, #tpu.memory_space<vmem>>) attributes {dimension_semantics = [#tpu.dimension_semantics<parallel>], iteration_bounds = array<i64: 2>, scalar_prefetch = 0 : i64, scratch_operands = 0 : i64, tpu.core_type = #tpu.core_type<tc>, window_params = [{transform_indices = @transform_0, window_bounds = array<i64: 8, 768>}, {pipeline_mode = #tpu.pipeline_mode<synchronous>, transform_indices = @transform_1, window_bounds = array<i64: 768, 256>}, {pipeline_mode = #tpu.pipeline_mode<synchronous>, transform_indices = @transform_2, window_bounds = array<i64: 1, 256>}, {pipeline_mode = #tpu.pipeline_mode<synchronous>, transform_indices = @transform_3, window_bounds = array<i64: 1, 256>}, {transform_indices = @transform_4, window_bounds = array<i64: 1>}, {transform_indices = @transform_5, window_bounds = array<i64: 8, 1>}]} {
    %c0 = arith.constant 0 : index
    %c0_0 = arith.constant 0 : index
    %0 = vector.load %arg1[%c0, %c0_0] : memref<8x768xf32, #tpu.memory_space<vmem>>, vector<8x768xf32>
    %1 = arith.truncf %0 : vector<8x768xf32> to vector<8x768xbf16>
    %c0_1 = arith.constant 0 : index
    %c0_2 = arith.constant 0 : index
    %2 = vector.load %arg2[%c0_1, %c0_2] : memref<768x256xbf16, #tpu.memory_space<vmem>>, vector<768x256xbf16>
    %cst = arith.constant dense<0.000000e+00> : vector<8x256xf32>
    %3 = tpu.matmul %1, %2, %cst {dimension_numbers = #tpu.dot_dimension_numbers<[1], [0], [0], [1], [0, 0, 1, 1], [], []>} : vector<8x768xbf16>, vector<768x256xbf16>, vector<8x256xf32> -> vector<8x256xf32>
    %c0_3 = arith.constant 0 : index
    %c0_4 = arith.constant 0 : index
    %4 = vector.load %arg3[%c0_3, %c0_4] : memref<1x256xf32, #tpu.memory_space<vmem>>, vector<1x256xf32>
    %5 = vector.broadcast %4 : vector<1x256xf32> to vector<8x256xf32>
    %6 = arith.addf %3, %5 : vector<8x256xf32>
    %cst_5 = arith.constant 0.000000e+00 : f32
    %7 = vector.broadcast %cst_5 : f32 to vector<8x256xf32>
    %8 = arith.maximumf %6, %7 : vector<8x256xf32>
    %c0_6 = arith.constant 0 : index
    %c0_7 = arith.constant 0 : index
    %9 = vector.load %arg4[%c0_6, %c0_7] : memref<1x256xf32, #tpu.memory_space<vmem>>, vector<1x256xf32>
    %10 = vector.broadcast %9 : vector<1x256xf32> to vector<8x256xf32>
    %11 = arith.mulf %8, %10 : vector<8x256xf32>
    %cst_8 = arith.constant dense<0.000000e+00> : vector<8xf32>
    %12 = vector.multi_reduction <add>, %11, %cst_8 [1] : vector<8x256xf32> to vector<8xf32>
    %13 = vector.shape_cast %12 : vector<8xf32> to vector<8x1xf32>
    %c0_9 = arith.constant 0 : index
    %14 = memref.load %arg5[%c0_9] : memref<1xf32, #tpu.memory_space<smem>>
    %15 = vector.broadcast %14 : f32 to vector<8x1xf32>
    %16 = arith.addf %13, %15 : vector<8x1xf32>
    %c0_10 = arith.constant 0 : index
    %c0_11 = arith.constant 0 : index
    %17 = vector.load %arg6[%c0_10, %c0_11] : memref<8x1xf32, #tpu.memory_space<vmem>>, vector<8x1xf32>
    tpu.vector_store %arg6[%c0_10, %c0_11], %16 {strides = array<i32>} : memref<8x1xf32, #tpu.memory_space<vmem>>, vector<8x1xf32>,
    return
  }
  func.func @transform_0(%arg0: i32) -> (i32, i32) {
    %c0_i32 = arith.constant 0 : i32
    %c0_i32_0 = arith.constant 0 : i32
    return %arg0, %c0_i32 : i32, i32
  }
  func.func @transform_1(%arg0: i32) -> (i32, i32) {
    %c0_i32 = arith.constant 0 : i32
    %c0_i32_0 = arith.constant 0 : i32
    %c0_i32_1 = arith.constant 0 : i32
    return %c0_i32, %c0_i32_0 : i32, i32
  }
  func.func @transform_2(%arg0: i32) -> (i32, i32) {
    %c0_i32 = arith.constant 0 : i32
    %c0_i32_0 = arith.constant 0 : i32
    %c0_i32_1 = arith.constant 0 : i32
    return %c0_i32, %c0_i32_0 : i32, i32
  }
  func.func @transform_3(%arg0: i32) -> (i32, i32) {
    %c0_i32 = arith.constant 0 : i32
    %c0_i32_0 = arith.constant 0 : i32
    %c0_i32_1 = arith.constant 0 : i32
    return %c0_i32, %c0_i32_0 : i32, i32
  }
  func.func @transform_4(%arg0: i32) -> i32 {
    %c0_i32 = arith.constant 0 : i32
    %c0_i32_0 = arith.constant 0 : i32
    return %c0_i32 : i32
  }
  func.func @transform_5(%arg0: i32) -> (i32, i32) {
    %c0_i32 = arith.constant 0 : i32
    %c0_i32_0 = arith.constant 0 : i32
    return %arg0, %c0_i32 : i32, i32
  }
}

</mosaic_0001>

<bundles_post_ra>
// kernel: reward_model_forward.1
= control target key start
LH: loop header
LB: loop body
LE: loop exit
PB: predicated region body
PF: predicated region fallthrough
CT: control target
= control target key end

     0   :  { %s1323_s20 = smov 0   ;;  %s1650_s0 = inlined_call_operand.vmem [shape: f32[16,768], index: 0, kind: input, shape index: {}]   ;;  %s1651_s1 = inlined_call_operand.vmem [shape: bf16[768,256], index: 1, kind: input, shape index: {}]   ;;  %s1652_s2 = inlined_call_operand.vmem [shape: f32[1,256], index: 2, kind: input, shape index: {}]   ;;  %s1653_s3 = inlined_call_operand.vmem [shape: f32[1,256], index: 3, kind: input, shape index: {}]   ;;  %s1654_s4 = inlined_call_operand.<no memory space> [shape: f32[1], index: 4, kind: input, shape index: {}]   ;;  %s1655_s5 = inlined_call_operand.vmem [shape: f32[16,1], index: 5, kind: output, shape index: {}]  }
   0x1   :  { %10 = sst [smem:[#allocation2]] %s1654_s4 }
   0x2 LB: > { %s1024_s21 = sadd.s32 4294967295, %s1288_s20   ;;  %p1028_p0 = scmp.ge.s32.totalorder %s1288_s20, 1  ;;  %s1288_s20 = sphi %s1323_s20, %s16_s20  }
   0x3   : > { %p188_p1 = scmp.lt.s32.totalorder %s1288_s20, 3 }
   0x5   : > { %p189_p2 = pnand %p1028_p0, %p188_p1 }
   0x6   : > { %p215_p3 = scmp.lt.s32.totalorder (!%p189_p2), %s1024_s21, 1  ;;  %s966_s7 = sld [smem:[#allocation2]] (!%p189_p2) }
   0x7   : > { %192 = sbr.rel (%p189_p2) target bundleno = 485 (0x1e5), region = 40 }
   0xc   : > { %v1138_v0 = vld [vmem:[%s1651_s1 + $0x74] ss:$8 sps:$4 sm:$0xff]   ;;  %v1140_v1 = vld [vmem:[%s1651_s1 + $0x70] ss:$8 sps:$4 sm:$0xff]   ;;  %v1144_v4 = vld [vmem:[%s1651_s1 + $0x64] ss:$8 sps:$4 sm:$0xff]  }
   0xd   : > { %824 = vmatprep.subr.bf16.mxu0 %v1138_v0  ;;  %v1141_v2 = vld [vmem:[%s1651_s1 + $0x174] ss:$8 sps:$4 sm:$0xff]   ;;  %v1143_v3 = vld [vmem:[%s1651_s1 + $0x170] ss:$8 sps:$4 sm:$0xff]   ;;  %v1146_v5 = vld [vmem:[%s1651_s1 + $0x60] ss:$8 sps:$4 sm:$0xff]  }
   0xe   : > { %825 = vmatpush1.bf16.msra.mxu0 %v1140_v1  ;;  %865 = vmatprep.subr.bf16.mxu1 %v1141_v2  ;;  %v1147_v6 = vld [vmem:[%s1651_s1 + $0x164] ss:$8 sps:$4 sm:$0xff]   ;;  %v1149_v7 = vld [vmem:[%s1651_s1 + $0x160] ss:$8 sps:$4 sm:$0xff]   ;;  %v1150_v8 = vld [vmem:[%s1651_s1 + $0x54] ss:$8 sps:$4 sm:$0xff]  }
   0xf   : > { %866 = vmatpush1.bf16.msra.mxu1 %v1143_v3  ;;  %826 = vmatprep.subr.bf16.mxu0 %v1144_v4  ;;  %v1152_v9 = vld [vmem:[%s1651_s1 + $0x50] ss:$8 sps:$4 sm:$0xff]   ;;  %v1153_v10 = vld [vmem:[%s1651_s1 + $0x154] ss:$8 sps:$4 sm:$0xff]   ;;  %v1156_v11 = vld [vmem:[%s1651_s1 + $0x44] ss:$8 sps:$4 sm:$0xff]  }
  0x10   : > { %867 = vmatprep.subr.bf16.mxu1 %v1147_v6  ;;  %v1155_v12 = vld [vmem:[%s1651_s1 + $0x150] ss:$8 sps:$4 sm:$0xff]   ;;  %v1159_v13 = vld [vmem:[%s1651_s1 + $0x144] ss:$8 sps:$4 sm:$0xff]   ;;  %v1158_v14 = vld [vmem:[%s1651_s1 + $0x40] ss:$8 sps:$4 sm:$0xff]  }
  0x11   : > { %v1162_v15 = vld [vmem:[%s1651_s1 + $0x34] ss:$8 sps:$4 sm:$0xff]   ;;  %v1161_v16 = vld [vmem:[%s1651_s1 + $0x140] ss:$8 sps:$4 sm:$0xff]   ;;  %v1164_v18 = vld [vmem:[%s1651_s1 + $0x30] ss:$8 sps:$4 sm:$0xff]  }
  0x12   : > { %827 = vmatpush1.bf16.msra.mxu0 %v1146_v5  ;;  %v1165_v17 = vld [vmem:[%s1651_s1 + $0x134] ss:$8 sps:$4 sm:$0xff]   ;;  %v1168_v19 = vld [vmem:[%s1651_s1 + $0x24] ss:$8 sps:$4 sm:$0xff]   ;;  %v1167_v20 = vld [vmem:[%s1651_s1 + $0x130] ss:$8 sps:$4 sm:$0xff]  }
  0x13   : > { %828 = vmatprep.subr.bf16.mxu0 %v1150_v8  ;;  %868 = vmatpush1.bf16.msra.mxu1 %v1149_v7  ;;  %v1171_v21 = vld [vmem:[%s1651_s1 + $0x124] ss:$8 sps:$4 sm:$0xff]   ;;  %v1170_v22 = vld [vmem:[%s1651_s1 + $0x20] ss:$8 sps:$4 sm:$0xff]   ;;  %v1174_v23 = vld [vmem:[%s1651_s1 + $0x14] ss:$8 sps:$4 sm:$0xff]  }
  0x14   : > { %869 = vmatprep.subr.bf16.mxu1 %v1153_v10  ;;  %v1173_v24 = vld [vmem:[%s1651_s1 + $0x120] ss:$8 sps:$4 sm:$0xff]   ;;  %v1177_v25 = vld [vmem:[%s1651_s1 + $0x114] ss:$8 sps:$4 sm:$0xff]   ;;  %v1176_v26 = vld [vmem:[%s1651_s1 + $0x10] ss:$8 sps:$4 sm:$0xff]  }
  0x15   : > { %v1180_v27 = vld [vmem:[%s1651_s1 + $0x4] ss:$8 sps:$4 sm:$0xff]   ;;  %v1179_v28 = vld [vmem:[%s1651_s1 + $0x110] ss:$8 sps:$4 sm:$0xff]   ;;  %v1182_v30 = vld [vmem:[%s1651_s1] ss:$8 sps:$4 sm:$0xff]  }
  0x16   : > { %829 = vmatpush1.bf16.msra.mxu0 %v1152_v9  ;;  %v1183_v29 = vld [vmem:[%s1651_s1 + $0x104] ss:$8 sps:$4 sm:$0xff]   ;;  %v1186_v31 = vld [vmem:[%s1651_s1 + $0xf4] ss:$8 sps:$4 sm:$0xff]   ;;  %v1185_v32 = vld [vmem:[%s1651_s1 + $0x100] ss:$8 sps:$4 sm:$0xff]  }
  0x17   : > { %830 = vmatprep.subr.bf16.mxu0 %v1156_v11  ;;  %870 = vmatpush1.bf16.msra.mxu1 %v1155_v12  ;;  %v1189_v33 = vld [vmem:[%s1651_s1 + $0x1f4] ss:$8 sps:$4 sm:$0xff]   ;;  %v1188_v34 = vld [vmem:[%s1651_s1 + $0xf0] ss:$8 sps:$4 sm:$0xff]   ;;  %s1657_s21 = smov (!%p215_p3, %s1024_s21), 1  ;;  %vm969_vm0 = vcmask 7168  }
  0x18   : > { %871 = vmatprep.subr.bf16.mxu1 %v1159_v13  ;;  %v1192_v35 = vld [vmem:[%s1651_s1 + $0xe4] ss:$8 sps:$4 sm:$0xff]   ;;  %v1191_v36 = vld [vmem:[%s1651_s1 + $0x1f0] ss:$8 sps:$4 sm:$0xff]   ;;  %v1194_v38 = vld [vmem:[%s1651_s1 + $0xe0] ss:$8 sps:$4 sm:$0xff]  }
  0x19   : > { %v1195_v37 = vld [vmem:[%s1651_s1 + $0x1e4] ss:$8 sps:$4 sm:$0xff]   ;;  %s1129_s27 = smul.u32 48, %s1657_s21  ;;  %v1198_v39 = vld [vmem:[%s1651_s1 + $0xd4] ss:$8 sps:$4 sm:$0xff]   ;;  %s1030_s8 = sshll.u32 %s1657_s21, 3 }
  0x1a   : > { %831 = vmatpush1.bf16.msra.mxu0 %v1158_v14  ;;  %v1197_v40 = vld [vmem:[%s1651_s1 + $0x1e0] ss:$8 sps:$4 sm:$0xff]   ;;  %v1201_v41 = vld [vmem:[%s1651_s1 + $0x1d4] ss:$8 sps:$4 sm:$0xff]   ;;  %v1200_v42 = vld [vmem:[%s1651_s1 + $0xd0] ss:$8 sps:$4 sm:$0xff]   ;;  %s223_s11 = scalar_lea.vmem %s1655_s5, %s1030_s8 }
  0x1b   : > { %832 = vmatprep.subr.bf16.mxu0 %v1162_v15  ;;  %872 = vmatpush1.bf16.msra.mxu1 %v1161_v16  ;;  %s1470_s13 = scalar_lea.vmem %s1650_s0, %s1129_s27  ;;  %v1204_v43 = vld [vmem:[%s1651_s1 + $0xc4] ss:$8 sps:$4 sm:$0xff]   ;;  %v1203_v44 = vld [vmem:[%s1651_s1 + $0x1d0] ss:$8 sps:$4 sm:$0xff]   ;;  %v1206_v47 = vld [vmem:[%s1651_s1 + $0xc0] ss:$8 sps:$4 sm:$0xff]  }
  0x1c   : > { %873 = vmatprep.subr.bf16.mxu1 %v1165_v17  ;;  %v1207_v45 = vld [vmem:[%s1651_s1 + $0x1c4] ss:$8 sps:$4 sm:$0xff]   ;;  %v1210_v49 = vld [vmem:[%s1651_s1 + $0xb4] ss:$8 sps:$4 sm:$0xff]   ;;  %v1209_v51 = vld [vmem:[%s1651_s1 + $0x1c0] ss:$8 sps:$4 sm:$0xff]  }
  0x1d   : > { %v225_v46 = vld [vmem:[%s1470_s13 + $0x8] sm:$0xff]  ;;  %v227_v50 = vld [vmem:[%s1470_s13 + $0x18] sm:$0xff]  ;;  %v224_v4 = vld [vmem:[%s1470_s13] sm:$0xff] }
  0x1e   : > { %833 = vmatpush1.bf16.msra.mxu0 %v1164_v18  ;;  %v231_v48 = vpack.c.bf16 %v225_v46, %v225_v46  ;;  %v233_v52 = vpack.c.bf16 %v227_v50, %v227_v50  ;;  %v1213_v53 = vld [vmem:[%s1651_s1 + $0x1b4] ss:$8 sps:$4 sm:$0xff]   ;;  %v1212_v54 = vld [vmem:[%s1651_s1 + $0xb0] ss:$8 sps:$4 sm:$0xff]   ;;  %v1216_v55 = vld [vmem:[%s1651_s1 + $0xa4] ss:$8 sps:$4 sm:$0xff]   ;;  %v230_v7 = vpack.c.bf16 %v224_v4, %v224_v4 }
  0x1f   : > { %834 = vmatprep.subr.bf16.mxu0 %v1168_v19  ;;  %874 = vmatpush1.bf16.msra.mxu1 %v1167_v20  ;;  %v1215_v56 = vld [vmem:[%s1651_s1 + $0x1b0] ss:$8 sps:$4 sm:$0xff]   ;;  %v1219_v57 = vld [vmem:[%s1651_s1 + $0x1a4] ss:$8 sps:$4 sm:$0xff]   ;;  %v1218_v58 = vld [vmem:[%s1651_s1 + $0xa0] ss:$8 sps:$4 sm:$0xff]  }
  0x20   : > { %875 = vmatprep.subr.bf16.mxu1 %v1171_v21  ;;  %856 = vmatprep.mubr.bf16.mxu0 %v231_v48  ;;  %v1222_v59 = vld [vmem:[%s1651_s1 + $0x94] ss:$8 sps:$4 sm:$0xff]   ;;  %v1221_v60 = vld [vmem:[%s1651_s1 + $0x1a0] ss:$8 sps:$4 sm:$0xff]   ;;  %v1224_v62 = vld [vmem:[%s1651_s1 + $0x90] ss:$8 sps:$4 sm:$0xff]  }
  0x21   : > { %897 = vmatprep.mubr.bf16.mxu1 %v233_v52  ;;  %v1225_v61 = vld [vmem:[%s1651_s1 + $0x194] ss:$8 sps:$4 sm:$0xff]   ;;  %v1228_v63 = vld [vmem:[%s1651_s1 + $0x84] ss:$8 sps:$4 sm:$0xff]   ;;  %v1227_v0 = vld [vmem:[%s1651_s1 + $0x190] ss:$8 sps:$4 sm:$0xff]   ;;  %v334_v52 = vlaneseq }
  0x22   : > { %835 = vmatpush1.bf16.msra.mxu0 %v1170_v22  ;;  %v1230_v1 = vld [vmem:[%s1651_s1 + $0x80] ss:$8 sps:$4 sm:$0xff]   ;;  %v1231_v2 = vld [vmem:[%s1651_s1 + $0x184] ss:$8 sps:$4 sm:$0xff]   ;;  %v1236_v5 = vld [vmem:[%s1651_s1 + $0x274] ss:$8 sps:$4 sm:$0xff]  }
  0x23   : > { %836 = vmatprep.subr.bf16.mxu0 %v1174_v23  ;;  %876 = vmatpush1.bf16.msra.mxu1 %v1173_v24  ;;  %v1233_v3 = vld [vmem:[%s1651_s1 + $0x180] ss:$8 sps:$4 sm:$0xff]   ;;  %v226_v6 = vld [vmem:[%s1470_s13 + $0x10] sm:$0xff]  ;;  %v1239_v10 = vld [vmem:[%s1651_s1 + $0x264] ss:$8 sps:$4 sm:$0xff]  }
  0x24   : > { %877 = vmatprep.subr.bf16.mxu1 %v1177_v25  ;;  %v1234_v8 = vld [vmem:[%s1651_s1 + $0x270] ss:$8 sps:$4 sm:$0xff]   ;;  %v232_v9 = vpack.c.bf16 %v226_v6, %v226_v6  ;;  %v229_v11 = vld [vmem:[%s1470_s13 + $0x28] sm:$0xff]  ;;  %v1242_v14 = vld [vmem:[%s1651_s1 + $0x254] ss:$8 sps:$4 sm:$0xff]  }
  0x25   : > { %v235_v12 = vpack.c.bf16 %v229_v11, %v229_v11  ;;  %v1237_v13 = vld [vmem:[%s1651_s1 + $0x260] ss:$8 sps:$4 sm:$0xff]   ;;  %v1240_v15 = vld [vmem:[%s1651_s1 + $0x250] ss:$8 sps:$4 sm:$0xff]   ;;  %v1245_v16 = vld [vmem:[%s1651_s1 + $0x244] ss:$8 sps:$4 sm:$0xff]  }
  0x26   : > { %837 = vmatpush1.bf16.msra.mxu0 %v1176_v26  ;;  %v1243_v17 = vld [vmem:[%s1651_s1 + $0x240] ss:$8 sps:$4 sm:$0xff]   ;;  %v1248_v18 = vld [vmem:[%s1651_s1 + $0x234] ss:$8 sps:$4 sm:$0xff]   ;;  %v1246_v19 = vld [vmem:[%s1651_s1 + $0x230] ss:$8 sps:$4 sm:$0xff]  }
  0x27   : > { %838 = vmatprep.subr.bf16.mxu0 %v1180_v27  ;;  %878 = vmatpush1.bf16.msra.mxu1 %v1179_v28  ;;  %v1251_v20 = vld [vmem:[%s1651_s1 + $0x224] ss:$8 sps:$4 sm:$0xff]   ;;  %v1249_v21 = vld [vmem:[%s1651_s1 + $0x220] ss:$8 sps:$4 sm:$0xff]   ;;  %v1254_v22 = vld [vmem:[%s1651_s1 + $0x214] ss:$8 sps:$4 sm:$0xff]  }
  0x28   : > { %879 = vmatprep.subr.bf16.mxu1 %v1183_v29  ;;  %v1252_v23 = vld [vmem:[%s1651_s1 + $0x210] ss:$8 sps:$4 sm:$0xff]   ;;  %v1257_v24 = vld [vmem:[%s1651_s1 + $0x204] ss:$8 sps:$4 sm:$0xff]   ;;  %v1255_v25 = vld [vmem:[%s1651_s1 + $0x200] ss:$8 sps:$4 sm:$0xff]  }
  0x29   : > { %v1260_v26 = vld [vmem:[%s1651_s1 + $0x2f4] ss:$8 sps:$4 sm:$0xff]   ;;  %v1258_v27 = vld [vmem:[%s1651_s1 + $0x2f0] ss:$8 sps:$4 sm:$0xff]   ;;  %v1263_v28 = vld [vmem:[%s1651_s1 + $0x2e4] ss:$8 sps:$4 sm:$0xff]  }
  0x2a   : > { %839 = vmatpush1.bf16.msra.mxu0 %v1182_v30  ;;  %v1261_v29 = vld [vmem:[%s1651_s1 + $0x2e0] ss:$8 sps:$4 sm:$0xff]   ;;  %v1266_v30 = vld [vmem:[%s1651_s1 + $0x2d4] ss:$8 sps:$4 sm:$0xff]  }
  0x2b   : > { %840 = vmatprep.subr.bf16.mxu0 %v1186_v31  ;;  %880 = vmatpush1.bf16.msra.mxu1 %v1185_v32  ;;  %v1264_v31 = vld [vmem:[%s1651_s1 + $0x2d0] ss:$8 sps:$4 sm:$0xff]   ;;  %v1269_v32 = vld [vmem:[%s1651_s1 + $0x2c4] ss:$8 sps:$4 sm:$0xff]  }
  0x2c   : > { %881 = vmatprep.subr.bf16.mxu1 %v1189_v33  ;;  %v1267_v33 = vld [vmem:[%s1651_s1 + $0x2c0] ss:$8 sps:$4 sm:$0xff]  }
  0x2e   : > { %841 = vmatpush2.bf16.msra.mxu0 %v1188_v34  ;;  %v1272_v34 = vld [vmem:[%s1651_s1 + $0x2b4] ss:$8 sps:$4 sm:$0xff]  }
  0x2f   : > { %842 = vmatprep.subr.bf16.mxu0 %v1192_v35  ;;  %882 = vmatpush2.bf16.msra.mxu1 %v1191_v36  ;;  %v1270_v35 = vld [vmem:[%s1651_s1 + $0x2b0] ss:$8 sps:$4 sm:$0xff]   ;;  %v1275_v36 = vld [vmem:[%s1651_s1 + $0x2a4] ss:$8 sps:$4 sm:$0xff]  }
  0x30   : > { %883 = vmatprep.subr.bf16.mxu1 %v1195_v37  ;;  %v1273_v37 = vld [vmem:[%s1651_s1 + $0x2a0] ss:$8 sps:$4 sm:$0xff]  }
  0x32   : > { %843 = vmatpush2.bf16.msra.mxu0 %v1194_v38  ;;  %v1278_v38 = vld [vmem:[%s1651_s1 + $0x294] ss:$8 sps:$4 sm:$0xff]  }
  0x33   : > { %844 = vmatprep.subr.bf16.mxu0 %v1198_v39  ;;  %884 = vmatpush2.bf16.msra.mxu1 %v1197_v40  ;;  %v1276_v39 = vld [vmem:[%s1651_s1 + $0x290] ss:$8 sps:$4 sm:$0xff]   ;;  %v1281_v40 = vld [vmem:[%s1651_s1 + $0x284] ss:$8 sps:$4 sm:$0xff]  }
  0x34   : > { %885 = vmatprep.subr.bf16.mxu1 %v1201_v41  ;;  %v1279_v41 = vld [vmem:[%s1651_s1 + $0x280] ss:$8 sps:$4 sm:$0xff]  }
  0x36   : > { %845 = vmatpush2.bf16.msra.mxu0 %v1200_v42  ;;  %v228_v42 = vld [vmem:[%s1470_s13 + $0x20] sm:$0xff] }
  0x37   : > { %846 = vmatprep.subr.bf16.mxu0 %v1204_v43  ;;  %886 = vmatpush2.bf16.msra.mxu1 %v1203_v44  ;;  %v234_v43 = vpack.c.bf16 %v228_v42, %v228_v42 }
  0x38   : > { %887 = vmatprep.subr.bf16.mxu1 %v1207_v45 }
  0x3a   : > { %847 = vmatpush2.bf16.msra.mxu0 %v1206_v47 }
  0x3b   : > { %848 = vmatprep.subr.bf16.mxu0 %v1210_v49  ;;  %888 = vmatpush2.bf16.msra.mxu1 %v1209_v51 }
  0x3c   : > { %889 = vmatprep.subr.bf16.mxu1 %v1213_v53  ;;  %v335_v53 = vshrl.u32 %v334_v52, 7 }
  0x3e   : > { %849 = vmatpush2.bf16.msra.mxu0 %v1212_v54  ;;  %v336_v54 = vsub.s32 0, %v335_v53 }
  0x3f   : > { %850 = vmatprep.subr.bf16.mxu0 %v1216_v55  ;;  %890 = vmatpush2.bf16.msra.mxu1 %v1215_v56  ;;  %v332_v55 = vld [vmem:[%s1652_s2] sm:$0x3]  ;;  %v340_v56 = vsub.s32 1, %v335_v53 }
  0x40   : > { %891 = vmatprep.subr.bf16.mxu1 %v1219_v57  ;;  %v337_v57 = vrot.slane %v332_v55, %v336_v54 }
  0x42   : > { %851 = vmatpush2.bf16.msra.mxu0 %v1218_v58  ;;  %v341_v58 = vrot.slane %v332_v55, %v340_v56 }
  0x43   : > { %852 = vmatprep.subr.bf16.mxu0 %v1222_v59  ;;  %892 = vmatpush2.bf16.msra.mxu1 %v1221_v60 }
  0x44   : > { %893 = vmatprep.subr.bf16.mxu1 %v1225_v61 }
  0x46   : > { %853 = vmatpush2.bf16.msra.mxu0 %v1224_v62 }
  0x47   : > { %854 = vmatprep.subr.bf16.mxu0 %v1228_v63  ;;  %894 = vmatpush2.bf16.msra.mxu1 %v1227_v0  ;;  %v949_v63 = vld [vmem:[%s1653_s3] sm:$0x3] }
  0x48   : > { %895 = vmatprep.subr.bf16.mxu1 %v1231_v2  ;;  %v958_v6 = vrot.slane %v949_v63, %v340_v56 }
  0x4a   : > { %855 = vmatpush2.bf16.msra.mxu0 %v1230_v1 }
  0x4b   : > { %906 = vmatprep.subr.bf16.mxu0 %v1236_v5  ;;  %896 = vmatpush2.bf16.msra.mxu1 %v1233_v3  ;;  %v954_v5 = vrot.slane %v949_v63, %v336_v54 }
  0x4d   : > { %857 = vmatmul.mubr.bf16.vlgmr.msra.gmra.mxu0 %v230_v7 }
  0x4e   : > { %907 = vmatpush1.bf16.msra.mxu0 %v1234_v8  ;;  %898 = vmatmul.mubr.bf16.vlgmr.msra.gmra.mxu1 %v232_v9 }
  0x4f   : > { %908 = vmatprep.subr.bf16.mxu0 %v1239_v10  ;;  %938 = vmatprep.mubr.bf16.mxu0 %v235_v12 }
  0x52   : > { %909 = vmatpush1.bf16.msra.mxu0 %v1237_v13  ;;  %v967_v13 = vstv %s966_s7 }
  0x53   : > { %910 = vmatprep.subr.bf16.mxu0 %v1242_v14 }
  0x56   : > { %911 = vmatpush1.bf16.msra.mxu0 %v1240_v15 }
  0x57   : > { %912 = vmatprep.subr.bf16.mxu0 %v1245_v16 }
  0x5a   : > { %913 = vmatpush1.bf16.msra.mxu0 %v1243_v17 }
  0x5b   : > { %914 = vmatprep.subr.bf16.mxu0 %v1248_v18 }
  0x5e   : > { %915 = vmatpush1.bf16.msra.mxu0 %v1246_v19 }
  0x5f   : > { %916 = vmatprep.subr.bf16.mxu0 %v1251_v20 }
  0x62   : > { %917 = vmatpush1.bf16.msra.mxu0 %v1249_v21 }
  0x63   : > { %918 = vmatprep.subr.bf16.mxu0 %v1254_v22 }
  0x66   : > { %919 = vmatpush1.bf16.msra.mxu0 %v1252_v23 }
  0x67   : > { %920 = vmatprep.subr.bf16.mxu0 %v1257_v24 }
  0x6a   : > { %921 = vmatpush1.bf16.msra.mxu0 %v1255_v25 }
  0x6b   : > { %922 = vmatprep.subr.bf16.mxu0 %v1260_v26 }
  0x6e   : > { %923 = vmatpush2.bf16.msra.mxu0 %v1258_v27 }
  0x6f   : > { %924 = vmatprep.subr.bf16.mxu0 %v1263_v28 }
  0x72   : > { %925 = vmatpush2.bf16.msra.mxu0 %v1261_v29 }
  0x73   : > { %926 = vmatprep.subr.bf16.mxu0 %v1266_v30 }
  0x76   : > { %927 = vmatpush2.bf16.msra.mxu0 %v1264_v31 }
  0x77   : > { %928 = vmatprep.subr.bf16.mxu0 %v1269_v32 }
  0x7a   : > { %929 = vmatpush2.bf16.msra.mxu0 %v1267_v33 }
  0x7b   : > { %930 = vmatprep.subr.bf16.mxu0 %v1272_v34 }
  0x7e   : > { %931 = vmatpush2.bf16.msra.mxu0 %v1270_v35 }
  0x7f   : > { %932 = vmatprep.subr.bf16.mxu0 %v1275_v36 }
  0x82   : > { %933 = vmatpush2.bf16.msra.mxu0 %v1273_v37 }
  0x83   : > { %934 = vmatprep.subr.bf16.mxu0 %v1278_v38 }
  0x86   : > { %935 = vmatpush2.bf16.msra.mxu0 %v1276_v39 }
  0x87   : > { %936 = vmatprep.subr.bf16.mxu0 %v1281_v40 }
  0x8a   : > { %937 = vmatpush2.bf16.msra.mxu0 %v1279_v41 }
  0x8d   : > { %939 = vmatmul.mubr.bf16.vlgmr.msra.gmra.mxu0 %v234_v43 }
 0x10d   : > { %v858_v44 = vpop.f32.mrf.mxu0 }
 0x10e   : > { %v899_v46 = vpop.f32.mrf.mxu1  ;;  %v859_v59 = vadd.f32 %v858_v44, %v337_v57 }
 0x10f   : > { %v860_v45 = vpop.f32.mrf.mxu0 }
 0x110   : > { %v901_v48 = vpop.f32.mrf.mxu1  ;;  %v861_v60 = vadd.f32 %v860_v45, %v341_v58  ;;  %v900_v61 = vadd.f32 %v899_v46, %v859_v59 }
 0x111   : > { %v862_v47 = vpop.f32.mrf.mxu0 }
 0x112   : > { %v903_v50 = vpop.f32.mrf.mxu1  ;;  %v902_v0 = vadd.f32 %v901_v48, %v861_v60 }
 0x113   : > { %v863_v49 = vpop.f32.mrf.mxu0 }
 0x114   : > { %v904_v51 = vpop.f32.mrf.mxu1 }
 0x14d   : > { %v940_v62 = vpop.f32.mrf.mxu0 }
 0x14e   : > { %v941_v1 = vadd.f32 %v940_v62, %v900_v61 }
 0x14f   : > { %v942_v2 = vpop.f32.mrf.mxu0 }
 0x150   : > { %v947_v3 = vmax.f32 %v941_v1, 0.0  ;;  %v943_v4 = vadd.f32 %v942_v2, %v902_v0 }
 0x151   : > { %v944_v7 = vpop.f32.mrf.mxu0 }
 0x152   : > { %v948_v8 = vmax.f32 %v943_v4, 0.0  ;;  %v961_v10 = vmul.f32 %v954_v5, %v947_v3 }
 0x153   : > { %v945_v9 = vpop.f32.mrf.mxu0 }
 0x154   : > { %v962_v11 = vmul.f32 %v958_v6, %v948_v8 }
 0x156   : > { %v963_v12 = vadd.f32 %v962_v11, %v961_v10 }
 0x158   : > { %964 = vadd.xlane.f32.xlu0 %v963_v12 }
 0x1e1   : > { %v965_v14 = vpop.xlane.xlu0 %964 }
 0x1e2   : > { %v968_v15 = vadd.f32 %v967_v13, %v965_v14 }
 0x1e4   : > { %970 = vst.msk [vmem:[%s223_s11] sm:$0xff] %vm969_vm0, %v968_v15 }
 0x1e5 PF: > { %s16_s20 = sadd.s32 1, %s1288_s20  }
 0x1e6   : > { %p13_p4 = scmp.ge.s32.totalorder %s16_s20, 4  }
 0x1e8   :  { %15 = sbr.rel (!%p13_p4) target bundleno = 2 (0x2), region = 70 }

</bundles_post_ra>
